<compile_context>
chip_gen: v7x
topology: tpu7x:2x2x1
jax: 0.10.0
libtpu: 0.0.40
codegen_flags: <defaults>
</compile_context>

<pallas_src>
import jax
import jax.numpy as jnp
from jax.experimental import pallas as pl
from jax.experimental.pallas import tpu as pltpu


def _round_up(x, m):
    return ((x + m - 1) // m) * m


def _make_logreg_kernel(compute_dtype):
    def _logreg_kernel(x_ref, w_ref, b_ref, o_ref):
        # x_ref: [TM, D_in]         (f32 in HBM; optionally cast to bf16 here)
        # w_ref: [D_in, D_out_pad]  (K x N, MXU weight-stationary friendly)
        # b_ref: [1, D_out_pad]     f32
        # o_ref: [TM, D_out_pad]    f32
        x = x_ref[...]
        w = w_ref[...]
        if compute_dtype is not None:
            x = x.astype(compute_dtype)      # in-kernel cast: no extra HBM pass
        z = jnp.dot(x, w, preferred_element_type=jnp.float32)   # MXU, f32 acc
        z = z + b_ref[...]                                      # VPU bias add
        o_ref[...] = jax.nn.sigmoid(z).astype(o_ref.dtype)      # exp -> EUP
    return _logreg_kernel


def logistic_regression(x, weight, bias, *, block_rows=512, compute_dtype=None):
    """Equivalent of torch.sigmoid(nn.Linear(D_in, D_out)(x)).

    x:      [B, D_in]      f32
    weight: [D_out, D_in]  f32 (PyTorch nn.Linear layout)
    bias:   [D_out]        f32
    compute_dtype: optional MXU operand dtype (e.g. jnp.bfloat16 on v6e/v7x).
                   Accumulation, bias add and sigmoid stay f32.
    Returns [B, D_out] f32.
    """
    B, D_in = x.shape
    D_out = weight.shape[0]

    SUBLANE = 8
    lane = 256 if D_out > 128 else 128           # 256-wide N tiles fill v6e/v7x MXU
    d_out_p = _round_up(D_out, lane)             # lane-dense output width

    # Row-tile selection: cdiv-balanced so a ragged batch never doubles the work,
    # and >= 2 grid steps (when B allows) so v7x can shard across both TCs.
    min_steps = 2 if B >= 2 * SUBLANE else 1
    num_tiles = max(pl.cdiv(B, block_rows), min_steps)
    tm = min(_round_up(pl.cdiv(B, num_tiles), SUBLANE), _round_up(B, SUBLANE))
    grid = (pl.cdiv(B, tm),)                     # ragged last block masked by Pallas

    # One-time param prep (amortized across all grid steps / calls):
    #   weight -> [D_in, D_out_pad] (K x N), bias -> [1, D_out_pad].
    wt = weight.T
    if d_out_p != D_out:
        wt = jnp.pad(wt, ((0, 0), (0, d_out_p - D_out)))
    if compute_dtype is not None:
        wt = wt.astype(compute_dtype)
    bp = bias if d_out_p == D_out else jnp.pad(bias, (0, d_out_p - D_out))
    bp = bp.reshape(1, d_out_p).astype(jnp.float32)

    # VMEM footprint: x (double-buffered) + resident weight (single-buffered)
    # + bias + out (double-buffered), plus headroom.
    esize_x = jnp.dtype(x.dtype).itemsize
    esize_w = jnp.dtype(wt.dtype).itemsize
    vmem_bytes = (2 * tm * D_in * esize_x
                  + 1 * D_in * d_out_p * esize_w
                  + 2 * SUBLANE * d_out_p * 4
                  + 2 * tm * d_out_p * 4)
    vmem_limit = int(min(64 << 20, int(vmem_bytes * 1.5) + (2 << 20)))

    cost = pl.CostEstimate(
        flops=2 * B * D_in * d_out_p,
        transcendentals=B * d_out_p,
        bytes_accessed=(B * D_in * esize_x + D_in * d_out_p * esize_w
                        + d_out_p * 4 + B * d_out_p * 4),
    )

    out = pl.pallas_call(
        _make_logreg_kernel(compute_dtype),
        out_shape=jax.ShapeDtypeStruct((B, d_out_p), jnp.float32),
        grid=grid,
        in_specs=[
            # x: tiled along batch; pipelined (double-buffered) across the grid.
            pl.BlockSpec((tm, D_in), lambda i: (i, 0)),
            # weight / bias: constant block -> VMEM-resident, single-buffered.
            pl.BlockSpec((D_in, d_out_p), lambda i: (0, 0),
                         pipeline_mode=pl.Buffered(1)),
            pl.BlockSpec((1, d_out_p), lambda i: (0, 0),
                         pipeline_mode=pl.Buffered(1)),
        ],
        out_specs=pl.BlockSpec((tm, d_out_p), lambda i: (i, 0)),
        compiler_params=pltpu.CompilerParams(
            dimension_semantics=("parallel",),
            vmem_limit_bytes=vmem_limit,
        ),
        cost_estimate=cost,
    )(x, wt, bp)

    # Only the cheap lane-pad is sliced off (no batch slice / batch pad).
    return out if d_out_p == D_out else out[:, :D_out]


if __name__ == "__main__":
    key = jax.random.PRNGKey(0)
    kx, kw, kb = jax.random.split(key, 3)

    # Shapes consistent with the module: input_dimensions=32, output_dimensions=8.
    B, D_in, D_out = 8, 32, 8
    x = jax.random.normal(kx, (B, D_in), dtype=jnp.float32)
    # Deterministic init mimicking nn.Linear's uniform(-1/sqrt(fan_in), 1/sqrt(fan_in)).
    bound = 1.0 / jnp.sqrt(jnp.float32(D_in))
    weight = jax.random.uniform(kw, (D_out, D_in), dtype=jnp.float32,
                                minval=-bound, maxval=bound)
    bias = jax.random.uniform(kb, (D_out,), dtype=jnp.float32,
                              minval=-bound, maxval=bound)

    out = logistic_regression(x, weight, bias)
    out = jax.block_until_ready(out)
    ref = jax.nn.sigmoid(x @ weight.T + bias)
    assert out.shape == (B, D_out)
    assert jnp.allclose(out, ref, atol=1e-6, rtol=1e-6)

    # Ragged / multi-step grid path (exercises masked last block + 2-step grid).
    B2 = 300
    x2 = jax.random.normal(kx, (B2, D_in), dtype=jnp.float32)
    out2 = jax.block_until_ready(
        logistic_regression(x2, weight, bias, block_rows=128))
    ref2 = jax.nn.sigmoid(x2 @ weight.T + bias)
    assert out2.shape == (B2, D_out)
    assert jnp.allclose(out2, ref2, atol=1e-6, rtol=1e-6)

    print("KERNEL_OK")
</pallas_src>

<mosaic_0001>
module attributes {stable_mosaic.version = 11 : i64} {
  func.func @_logreg_kernel(%arg0: i32, %arg1: memref<8x32xf32, #tpu.memory_space<vmem>>, %arg2: memref<32x128xf32, #tpu.memory_space<vmem>>, %arg3: memref<1x128xf32, #tpu.memory_space<vmem>>, %arg4: memref<8x128xf32, #tpu.memory_space<vmem>>) attributes {dimension_semantics = [#tpu.dimension_semantics<parallel>], iteration_bounds = array<i64: 1>, scalar_prefetch = 0 : i64, scratch_operands = 0 : i64, tpu.core_type = #tpu.core_type<tc>, window_params = [{transform_indices = @transform_0, window_bounds = array<i64: 8, 32>}, {pipeline_mode = #tpu.pipeline_mode<synchronous>, transform_indices = @transform_1, window_bounds = array<i64: 32, 128>}, {pipeline_mode = #tpu.pipeline_mode<synchronous>, transform_indices = @transform_2, window_bounds = array<i64: 1, 128>}, {transform_indices = @transform_3, window_bounds = array<i64: 8, 128>}]} {
    %c0 = arith.constant 0 : index
    %c0_0 = arith.constant 0 : index
    %0 = vector.load %arg1[%c0, %c0_0] : memref<8x32xf32, #tpu.memory_space<vmem>>, vector<8x32xf32>
    %c0_1 = arith.constant 0 : index
    %c0_2 = arith.constant 0 : index
    %1 = vector.load %arg2[%c0_1, %c0_2] : memref<32x128xf32, #tpu.memory_space<vmem>>, vector<32x128xf32>
    %cst = arith.constant dense<0.000000e+00> : vector<8x128xf32>
    %2 = tpu.matmul %0, %1, %cst {dimension_numbers = #tpu.dot_dimension_numbers<[1], [0], [0], [1], [0, 0, 1, 1], [], []>} : vector<8x32xf32>, vector<32x128xf32>, vector<8x128xf32> -> vector<8x128xf32>
    %c0_3 = arith.constant 0 : index
    %c0_4 = arith.constant 0 : index
    %3 = vector.load %arg3[%c0_3, %c0_4] : memref<1x128xf32, #tpu.memory_space<vmem>>, vector<1x128xf32>
    %4 = vector.broadcast %3 : vector<1x128xf32> to vector<8x128xf32>
    %5 = arith.addf %2, %4 : vector<8x128xf32>
    %6 = arith.negf %5 : vector<8x128xf32>
    %7 = math.exp %6 : vector<8x128xf32>
    %cst_5 = arith.constant 1.000000e+00 : f32
    %8 = vector.broadcast %cst_5 : f32 to vector<8x128xf32>
    %9 = arith.addf %8, %7 : vector<8x128xf32>
    %10 = arith.divf %8, %9 : vector<8x128xf32>
    %c0_6 = arith.constant 0 : index
    %c0_7 = arith.constant 0 : index
    %11 = vector.load %arg4[%c0_6, %c0_7] : memref<8x128xf32, #tpu.memory_space<vmem>>, vector<8x128xf32>
    tpu.vector_store %arg4[%c0_6, %c0_7], %10 {strides = array<i32>} : memref<8x128xf32, #tpu.memory_space<vmem>>, vector<8x128xf32>,
    return
  }
  func.func @transform_0(%arg0: i32) -> (i32, i32) {
    %c0_i32 = arith.constant 0 : i32
    %c0_i32_0 = arith.constant 0 : i32
    return %arg0, %c0_i32 : i32, i32
  }
  func.func @transform_1(%arg0: i32) -> (i32, i32) {
    %c0_i32 = arith.constant 0 : i32
    %c0_i32_0 = arith.constant 0 : i32
    %c0_i32_1 = arith.constant 0 : i32
    return %c0_i32, %c0_i32_0 : i32, i32
  }
  func.func @transform_2(%arg0: i32) -> (i32, i32) {
    %c0_i32 = arith.constant 0 : i32
    %c0_i32_0 = arith.constant 0 : i32
    %c0_i32_1 = arith.constant 0 : i32
    return %c0_i32, %c0_i32_0 : i32, i32
  }
  func.func @transform_3(%arg0: i32) -> (i32, i32) {
    %c0_i32 = arith.constant 0 : i32
    %c0_i32_0 = arith.constant 0 : i32
    return %arg0, %c0_i32 : i32, i32
  }
}

</mosaic_0001>

<bundles_post_ra>
// kernel: tpu_custom_call.1
= control target key start
LH: loop header
LB: loop body
LE: loop exit
PB: predicated region body
PF: predicated region fallthrough
CT: control target
= control target key end

     0   :  { %8 = vsyncpa [#allocation3], 0  ;;  %s333_s0 = inlined_call_operand.hbm [shape: f32[8,32], index: 0, kind: input, shape index: {}]   ;;  %s334_s1 = inlined_call_operand.hbm [shape: f32[32,128], index: 1, kind: input, shape index: {}]   ;;  %s335_s2 = inlined_call_operand.vmem [shape: f32[1,128], index: 2, kind: input, shape index: {}]   ;;  %s336_s3 = inlined_call_operand.hbm [shape: f32[8,128], index: 3, kind: output, shape index: {}]  }
   0x1   :  { %9 = vsyncpa [#allocation6], 0 }
   0x2   :  { %10 = vsyncpa [#allocation4], 0  ;;  %s259_s12 = smov [#allocation2]   ;;  %s260_s14 = smov [#allocation5]  }
   0x3   :  { %s17_s13 = sshll.u32 %s259_s12, 4  ;;  %s26_s15 = sshll.u32 %s260_s14, 4  ;;  %s18_s13 = int_to_ptr.vmem [resolvable:$true] %s17_s13  ;;  %s287_s15 = int_to_ptr.vmem [resolvable:$true] %s26_s15 }
   0x4   :  { %s187_s18 = scalar_lea.hbm %s333_s0, 128 }
   0x5   :  { %p188_p0 = scmp.ne.s32.totalorder %s333_s0, %s187_s18  ;;  %p191_p1 = scmp.lt.u32.totalorder %s187_s18, %s333_s0 }
   0x7   :  { %p193_p2 = pnand %p191_p1, %p188_p0 }
   0x9   :  { %196 = shalt.err (!%p193_p2)
}
   0xa   :  { %s197_s23 = scalar_lea.vmem %s18_s13, 128  ;;  %p202_p4 = scmp.lt.s32.totalorder %s18_s13, %s18_s13 }
   0xb   :  { %p198_p3 = scmp.ne.s32.totalorder %s18_s13, %s197_s23  ;;  %p203_p5 = scmp.lt.s32.totalorder %s197_s23, %s197_s23 }
   0xd   :  { %p204_p6 = por %p203_p5, %p202_p4 }
   0xf   :  { %p205_p7 = pnand %p204_p6, %p198_p3 }
  0x11   :  { %208 = shalt.err (!%p205_p7)
}
  0x12   :  { %20 = dma.hbm_to_vmem [thread:$0]  %s333_s0, 128, %s18_s13, [#allocation3]  }
  0x13   :  { %s209_s28 = scalar_lea.hbm %s334_s1, 512 }
  0x14   :  { %p210_p8 = scmp.ne.s32.totalorder %s334_s1, %s209_s28  ;;  %p213_p9 = scmp.lt.u32.totalorder %s209_s28, %s334_s1 }
  0x16   :  { %p215_p10 = pnand %p213_p9, %p210_p8 }
  0x18   :  { %218 = shalt.err (!%p215_p10)
}
  0x19   :  { %s219_s6 = scalar_lea.vmem %s287_s15, 512  ;;  %p224_p12 = scmp.lt.s32.totalorder %s287_s15, %s287_s15 }
  0x1a   :  { %p220_p11 = scmp.ne.s32.totalorder %s287_s15, %s219_s6  ;;  %p225_p13 = scmp.lt.s32.totalorder %s219_s6, %s219_s6 }
  0x1c   :  { %p226_p0 = por %p225_p13, %p224_p12 }
  0x1e   :  { %p227_p1 = pnand %p226_p0, %p220_p11 }
  0x20   :  { %230 = shalt.err (!%p227_p1)
}
  0x21   :  { %s261_s0 = smov 128   ;;  %s262_s7 = smov 8  }
  0x22   :  { %32 = dma.hbm_to_vmem [thread:$0]  %s334_s1, 512, %s287_s15, [#allocation6], %s261_s0, %s261_s0, %s262_s7  }
  0x23   :  { %253 = dma.done.wait [#allocation3], 128  }
  0x24   :  { %254 = vsyncadd [#allocation3], 4294967168 }
  0x25   :  { %255 = dma.done.wait [#allocation6], 512  }
  0x26   :  { %256 = vsyncadd [#allocation6], 4294966784  ;;  %v263_v0 = vmov 0.0|0.0   ;;  %vm264_vm0 = vmmov 0   ;;  %v265_v1 = vmov 0.0   ;;  %v42_v2 = vld [vmem:[#allocation5] sm:$0xff] }
  0x27   :  { %169 = vmatprep.subr.bf16.mxu0 %v263_v0  ;;  %166 = vmatprep.mubr.msk.f32.mxu0 %vm264_vm0, %v265_v1  ;;  %v43_v3 = vld [vmem:[#allocation5 + $0x8] sm:$0xff]  ;;  %v44_v4 = vld [vmem:[#allocation5 + $0x10] sm:$0xff]  ;;  %v45_v6 = vld [vmem:[#allocation5 + $0x18] sm:$0xff]  ;;  %vm53_vm1 = vcmask 261120   ;;  %s266_s11 = smov [#allocation7]  }
  0x28   :  { %v170_v5 = vpack.c.bf16 %v43_v3, %v42_v2  ;;  %v173_v7 = vpack.c.bf16 %v45_v6, %v44_v4  ;;  %v41_v8 = vld [vmem:[#allocation2] sm:$0xff]  ;;  %s140_s12 = sshll.u32 %s266_s11, 4  ;;  %s141_s12 = int_to_ptr.vmem [resolvable:$true] %s140_s12 }
  0x29   :  { %v150_v9 = vld [vmem:[%s335_s2] ss:$0 sm:$0xff]  ;;  %s231_s13 = scalar_lea.vmem %s141_s12, 128  ;;  %p236_p3 = scmp.lt.s32.totalorder %s141_s12, %s141_s12 }
  0x2a   :  { %171 = vmatpush3.bf16.msra.mxu0 %v170_v5  ;;  %p232_p2 = scmp.ne.s32.totalorder %s141_s12, %s231_s13  ;;  %p237_p4 = scmp.lt.s32.totalorder %s231_s13, %s231_s13 }
  0x2b   :  { %172 = vmatprep.subr.bf16.mxu0 %v263_v0 }
  0x2c   :  { %p238_p5 = por %p237_p4, %p236_p3 }
  0x2e   :  { %174 = vmatpush3.bf16.msra.mxu0 %v173_v7  ;;  %p239_p6 = pnand %p238_p5, %p232_p2 }
  0x31   :  { %167 = vmatmul.mubr.msk.f32.vlgmr.msra.gmra.mrb[0].mxu0 %vm53_vm1, %v41_v8 }
 0x104   :  { %v123_v10 = vpop.f32.mrb[0].mxu0 }
 0x105   :  { %v124_v11 = vadd.f32 %v150_v9, %v123_v10  ;;  %v168_v12 = vpop.f32.mrb[1].mxu0 }
 0x107   :  { %v152_v13 = vmul.f32 -1.442695, %v124_v11 }
 0x109   :  { %183 = vpow2.f32 %v152_v13 }
 0x113   :  { %v184_v14 = vpop.eup %183 }
 0x114   :  { %v130_v15 = vadd.f32 1.0, %v184_v14 }
 0x116   :  { %185 = vrcp.f32 %v130_v15 }
 0x120   :  { %v186_v16 = vpop.eup %185 }
 0x121   :  { %133 = vst [vmem:[#allocation7] sm:$0xff] %v186_v16 }
 0x122   :  { %242 = shalt.err (!%p239_p6)
}
 0x123   :  { %s243_s15 = scalar_lea.hbm %s336_s3, 128 }
 0x124   :  { %p244_p7 = scmp.ne.s32.totalorder %s336_s3, %s243_s15  ;;  %p247_p8 = scmp.lt.u32.totalorder %s243_s15, %s336_s3 }
 0x126   :  { %p249_p9 = pnand %p247_p8, %p244_p7 }
 0x128   :  { %252 = shalt.err (!%p249_p9)
}
 0x129   :  { %143 = dma.vmem_to_hbm [thread:$0]  %s141_s12, 128, %s336_s3, [#allocation4]  }
 0x12a   :  { %257 = dma.done.wait [#allocation4], 128  }
 0x12b   :  { %258 = vsyncadd [#allocation4], 4294967168 }
 0x12c   :  { %147 = vsyncpa [#allocation3], 1 }
 0x12d   :  { %148 = vsyncpa [#allocation6], 1 }
 0x12e   :  { %149 = vsyncpa [#allocation4], 1 }

</bundles_post_ra>
